<compile_context>
chip_gen: v6e
topology: v6e:2x2x1
jax: 0.10.0
libtpu: 0.0.40
codegen_flags: <defaults>
</compile_context>

<pallas_src>
import jax
import jax.numpy as jnp
from jax.experimental import pallas as pl
from jax.experimental.pallas import tpu as pltpu

C_IN = 369
C_OUT = 123


def _conv1x1_kernel(x_ref, w_ref, b_ref, o_ref):
    # x_ref: (1, C_IN, ts)   w_ref: (C_OUT, C_IN)   b_ref: (C_OUT, 1)
    # o_ref: (1, C_OUT, ts)
    acc = jnp.dot(w_ref[...], x_ref[0], preferred_element_type=jnp.float32)
    o_ref[0] = (acc + b_ref[...]).astype(o_ref.dtype)


def conv1x1_pallas(x_nchw, weight, bias, *, tm=1024):
    """1x1 conv in native NCHW layout.

    x_nchw: (B, C_IN, H, W), weight: (C_OUT, C_IN), bias: (C_OUT,)
    returns (B, C_OUT, H, W).
    """
    B, C, H, W = x_nchw.shape
    assert C == C_IN, f"expected {C_IN} input channels, got {C}"
    HW = H * W

    # Free reshape (contiguous), no transpose, no padding copy.
    x3 = x_nchw.reshape(B, C_IN, HW)
    b_col = bias.reshape(C_OUT, 1)

    # Spatial tile: full extent when small (block == full dim is always legal),
    # otherwise a 128-multiple tile; the partial last block is masked by Pallas.
    if HW <= tm:
        ts = HW
    else:
        assert tm % 128 == 0, "spatial tile must be a multiple of 128 lanes"
        ts = tm
    grid = (B, pl.cdiv(HW, ts))

    itemsize = jnp.dtype(x_nchw.dtype).itemsize
    cost = pl.CostEstimate(
        flops=2 * B * HW * C_IN * C_OUT,
        transcendentals=0,
        bytes_accessed=(B * C_IN * HW + B * C_OUT * HW) * itemsize
        + (C_OUT * C_IN + C_OUT) * jnp.dtype(weight.dtype).itemsize,
    )

    out3 = pl.pallas_call(
        _conv1x1_kernel,
        out_shape=jax.ShapeDtypeStruct((B, C_OUT, HW), x_nchw.dtype),
        grid_spec=pltpu.PrefetchScalarGridSpec(
            num_scalar_prefetch=0,
            grid=grid,
            in_specs=[
                pl.BlockSpec((1, C_IN, ts), lambda b, j: (b, 0, j)),
                pl.BlockSpec((C_OUT, C_IN), lambda b, j: (0, 0)),
                pl.BlockSpec((C_OUT, 1), lambda b, j: (0, 0)),
            ],
            out_specs=pl.BlockSpec((1, C_OUT, ts), lambda b, j: (b, 0, j)),
        ),
        compiler_params=pltpu.CompilerParams(
            dimension_semantics=("parallel", "parallel"),
        ),
        cost_estimate=cost,
    )(x3, weight, b_col)

    return out3.reshape(B, C_OUT, H, W)


def init_params(key):
    """Deterministic init mirroring torch.nn.Conv2d default (kaiming-uniform-ish)."""
    k_w, k_b = jax.random.split(key)
    fan_in = C_IN  # kernel_size = 1
    bound = 1.0 / jnp.sqrt(fan_in)
    weight = jax.random.uniform(k_w, (C_OUT, C_IN), jnp.float32, -bound, bound)
    bias = jax.random.uniform(k_b, (C_OUT,), jnp.float32, -bound, bound)
    return weight, bias


if __name__ == "__main__":
    key = jax.random.PRNGKey(0)
    k_x, k_p = jax.random.split(key)

    B, H, W = 2, 8, 8
    x = jax.random.normal(k_x, (B, C_IN, H, W), jnp.float32)
    weight, bias = init_params(k_p)

    out = conv1x1_pallas(x, weight, bias)
    out = jax.block_until_ready(out)

    # Reference check against plain-JAX 1x1 conv semantics.
    ref = jnp.einsum("bchw,oc->bohw", x, weight) + bias[None, :, None, None]
    assert out.shape == (B, C_OUT, H, W), out.shape
    assert jnp.allclose(out, ref, atol=1e-4, rtol=1e-4)

    print("KERNEL_OK")
</pallas_src>

<mosaic_0001>
module attributes {stable_mosaic.version = 11 : i64} {
  func.func @_conv1x1_kernel(%arg0: i32, %arg1: i32, %arg2: memref<1x369x64xf32, #tpu.memory_space<vmem>>, %arg3: memref<123x369xf32, #tpu.memory_space<vmem>>, %arg4: memref<123x1xf32, #tpu.memory_space<vmem>>, %arg5: memref<1x123x64xf32, #tpu.memory_space<vmem>>) attributes {dimension_semantics = [#tpu.dimension_semantics<parallel>, #tpu.dimension_semantics<parallel>], iteration_bounds = array<i64: 2, 1>, scalar_prefetch = 0 : i64, scratch_operands = 0 : i64, tpu.core_type = #tpu.core_type<tc>, window_params = [{transform_indices = @transform_0, window_bounds = array<i64: 1, 369, 64>}, {pipeline_mode = #tpu.pipeline_mode<synchronous>, transform_indices = @transform_1, window_bounds = array<i64: 123, 369>}, {pipeline_mode = #tpu.pipeline_mode<synchronous>, transform_indices = @transform_2, window_bounds = array<i64: 123, 1>}, {transform_indices = @transform_3, window_bounds = array<i64: 1, 123, 64>}]} {
    %c0 = arith.constant 0 : index
    %c0_0 = arith.constant 0 : index
    %0 = vector.load %arg3[%c0, %c0_0] : memref<123x369xf32, #tpu.memory_space<vmem>>, vector<123x369xf32>
    %c0_1 = arith.constant 0 : index
    %c0_2 = arith.constant 0 : index
    %c0_3 = arith.constant 0 : index
    %1 = vector.load %arg2[%c0_1, %c0_2, %c0_3] : memref<1x369x64xf32, #tpu.memory_space<vmem>>, vector<1x369x64xf32>
    %2 = vector.shape_cast %1 : vector<1x369x64xf32> to vector<369x64xf32>
    %cst = arith.constant dense<0.000000e+00> : vector<123x64xf32>
    %3 = tpu.matmul %0, %2, %cst {dimension_numbers = #tpu.dot_dimension_numbers<[1], [0], [0], [1], [0, 0, 1, 1], [], []>} : vector<123x369xf32>, vector<369x64xf32>, vector<123x64xf32> -> vector<123x64xf32>
    %c0_4 = arith.constant 0 : index
    %c0_5 = arith.constant 0 : index
    %4 = vector.load %arg4[%c0_4, %c0_5] : memref<123x1xf32, #tpu.memory_space<vmem>>, vector<123x1xf32>
    %5 = vector.broadcast %4 : vector<123x1xf32> to vector<123x64xf32>
    %6 = arith.addf %3, %5 : vector<123x64xf32>
    %c0_6 = arith.constant 0 : index
    %c0_7 = arith.constant 0 : index
    %c0_8 = arith.constant 0 : index
    %7 = vector.load %arg5[%c0_6, %c0_7, %c0_8] : memref<1x123x64xf32, #tpu.memory_space<vmem>>, vector<1x123x64xf32>
    %8 = vector.shape_cast %7 : vector<1x123x64xf32> to vector<123x64xf32>
    %9 = vector.shape_cast %6 : vector<123x64xf32> to vector<1x123x64xf32>
    tpu.vector_store %arg5[%c0_6, %c0_7, %c0_8], %9 {strides = array<i32>} : memref<1x123x64xf32, #tpu.memory_space<vmem>>, vector<1x123x64xf32>,
    return
  }
  func.func @transform_0(%arg0: i32, %arg1: i32) -> (i32, i32, i32) {
    %c0_i32 = arith.constant 0 : i32
    %c0_i32_0 = arith.constant 0 : i32
    return %arg0, %c0_i32, %arg1 : i32, i32, i32
  }
  func.func @transform_1(%arg0: i32, %arg1: i32) -> (i32, i32) {
    %c0_i32 = arith.constant 0 : i32
    %c0_i32_0 = arith.constant 0 : i32
    %c0_i32_1 = arith.constant 0 : i32
    return %c0_i32, %c0_i32_0 : i32, i32
  }
  func.func @transform_2(%arg0: i32, %arg1: i32) -> (i32, i32) {
    %c0_i32 = arith.constant 0 : i32
    %c0_i32_0 = arith.constant 0 : i32
    %c0_i32_1 = arith.constant 0 : i32
    return %c0_i32, %c0_i32_0 : i32, i32
  }
  func.func @transform_3(%arg0: i32, %arg1: i32) -> (i32, i32, i32) {
    %c0_i32 = arith.constant 0 : i32
    %c0_i32_0 = arith.constant 0 : i32
    return %arg0, %c0_i32, %arg1 : i32, i32, i32
  }
}

</mosaic_0001>

<bundles_post_ra>
// kernel: tpu_custom_call.1
= control target key start
LH: loop header
LB: loop body
LE: loop exit
PB: predicated region body
PF: predicated region fallthrough
CT: control target
= control target key end

     0   :  { %s1103_s12 = smov 0   ;;  %s1105_s13 = smov 0   ;;  %s1430_s0 = inlined_call_operand.vmem [shape: f32[2,369,64], index: 0, kind: input, shape index: {}]   ;;  %s1431_s1 = inlined_call_operand.vmem [shape: f32[123,369], index: 1, kind: input, shape index: {}]   ;;  %s1432_s2 = inlined_call_operand.vmem [shape: f32[123,1], index: 2, kind: input, shape index: {}]   ;;  %s1433_s3 = inlined_call_operand.vmem [shape: f32[2,123,64], index: 3, kind: output, shape index: {}]  }
   0x1   :  { %s1107_s14 = smov 0  }
   0x2 LB: > { %s25_s15 = sadd.s32 1, %s1076_s13  ;;  %p841_p0 = scmp.ge.s32.totalorder %s1080_s14, 1  ;;  %s1080_s14 = sphi %s1107_s14, %s13_s14   ;;  %s1076_s13 = sphi %s1105_s13, %s1435_s13   ;;  %s1072_s12 = sphi %s1103_s12, %s1434_s12  }
   0x3   : > { %p27_p1 = scmp.ge.s32.totalorder %s25_s15, 2  ;;  %p156_p2 = scmp.lt.s32.totalorder %s1080_s14, 3 }
   0x5   : > { %s1437_s15 = smov (%p27_p1, %s25_s15), 0  ;;  %p157_p3 = pnand %p841_p0, %p156_p2 }
   0x6   : > { %p186_p4 = scmp.lt.s32.totalorder (!%p157_p3), %s1072_s12, 1 }
   0x7   : > { %160 = sbr.rel (%p157_p3) target bundleno = 311 (0x137), region = 32 }
   0xc   : > { %v203_v0 = vld [vmem:[%s1431_s1 + $0x8] sm:$0xff]  ;;  %vm393_vm0 = vcmask 924672   ;;  %v204_v1 = vld [vmem:[%s1431_s1 + $0x10] sm:$0xff]  ;;  %s1439_s12 = smov (!%p186_p4, %s1072_s12), 1  ;;  %v1082_v2 = vmov 0   ;;  %vm442_vm1 = vcmask 1040384  }
   0xd   : > { %510 = vmatprep.mubr.f32.mxu0 %v203_v0  ;;  %1006 = vmatprep.mubr.msk.f32.mxu1 %vm393_vm0, %v204_v1  ;;  %s1030_s20 = smul.u32 376, %s1439_s12  ;;  %v202_v50 = vld [vmem:[%s1431_s1] sm:$0xff]  ;;  %v207_v51 = vld [vmem:[%s1431_s1 + $0x28] sm:$0xff]  ;;  %v299_v55 = vld [vmem:[%s1432_s2 + $0x10] sm:$0xff]  ;;  %s864_s6 = sshll.u32 %s1439_s12, 7  ;;  %vm736_vm2 = vcmask 523264  }
   0xe   : > { %1056 = vset.pattern.permute.xlu0 %v1082_v2  ;;  %1057 = vset.pattern.permute.xlu1 %v1082_v2  ;;  %v206_v52 = vld [vmem:[%s1431_s1 + $0x20] sm:$0xff]  ;;  %v205_v56 = vld [vmem:[%s1431_s1 + $0x18] sm:$0xff]  ;;  %v216_v59 = vld [vmem:[%s1431_s1 + $0x70] sm:$0xff]  ;;  %s1388_s9 = scalar_lea.vmem %s1433_s3, %s864_s6  ;;  %vm752_vm3 = vcmask 518144  }
   0xf   : > { %s1134_s23 = scalar_lea.vmem %s1430_s0, %s1030_s20  ;;  %v210_v53 = vld [vmem:[%s1431_s1 + $0x40] sm:$0xff]  ;;  %v213_v57 = vld [vmem:[%s1431_s1 + $0x58] sm:$0xff]  ;;  %325 = vperm.xlu1 %1057, %v299_v55   ;;  %v298_v60 = vld [vmem:[%s1432_s2 + $0x8] sm:$0xff] }
  0x10   : > { %v281_v3 = vld [vmem:[%s1134_s23 + $0xf8] sm:$0xff]  ;;  %v280_v5 = vld [vmem:[%s1134_s23 + $0xf0] sm:$0xff]  ;;  %v279_v7 = vld [vmem:[%s1134_s23 + $0xe8] sm:$0xff] }
  0x11   : > { %v265_v4 = vld [vmem:[%s1134_s23 + $0x78] sm:$0xff]  ;;  %865 = vmatprep.subr.mxu0 %v281_v3  ;;  %v264_v6 = vld [vmem:[%s1134_s23 + $0x70] sm:$0xff]  ;;  %v263_v9 = vld [vmem:[%s1134_s23 + $0x68] sm:$0xff] }
  0x12   : > { %866 = vmatpush3.msra.mxu0 %v265_v4  ;;  %v296_v8 = vld [vmem:[%s1134_s23 + $0x170] sm:$0x1]  ;;  %v295_v10 = vld [vmem:[%s1134_s23 + $0x168] sm:$0xff]  ;;  %v278_v11 = vld [vmem:[%s1134_s23 + $0xe0] sm:$0xff] }
  0x13   : > { %867 = vmatprep.subr.mxu0 %v280_v5  ;;  %976 = vmatprep.subr.msk.mxu1 %vm442_vm1, %v296_v8  ;;  %v294_v12 = vld [vmem:[%s1134_s23 + $0x160] sm:$0xff]  ;;  %v277_v14 = vld [vmem:[%s1134_s23 + $0xd8] sm:$0xff]  ;;  %v276_v17 = vld [vmem:[%s1134_s23 + $0xd0] sm:$0xff] }
  0x14   : > { %868 = vmatpush3.msra.mxu0 %v264_v6  ;;  %977 = vmatpush3.msk.msra.mxu1 %vm442_vm1, %v296_v8  ;;  %v262_v13 = vld [vmem:[%s1134_s23 + $0x60] sm:$0xff]  ;;  %v293_v15 = vld [vmem:[%s1134_s23 + $0x158] sm:$0xff]  ;;  %v292_v18 = vld [vmem:[%s1134_s23 + $0x150] sm:$0xff] }
  0x15   : > { %869 = vmatprep.subr.mxu0 %v279_v7  ;;  %978 = vmatprep.subr.mxu1 %v295_v10  ;;  %v261_v16 = vld [vmem:[%s1134_s23 + $0x58] sm:$0xff]  ;;  %v260_v19 = vld [vmem:[%s1134_s23 + $0x50] sm:$0xff]  ;;  %v275_v20 = vld [vmem:[%s1134_s23 + $0xc8] sm:$0xff] }
  0x16   : > { %870 = vmatpush3.msra.mxu0 %v263_v9  ;;  %979 = vmatpush3.msra.mxu1 %v295_v10  ;;  %v291_v21 = vld [vmem:[%s1134_s23 + $0x148] sm:$0xff]  ;;  %v274_v23 = vld [vmem:[%s1134_s23 + $0xc0] sm:$0xff]  ;;  %v273_v26 = vld [vmem:[%s1134_s23 + $0xb8] sm:$0xff] }
  0x17   : > { %871 = vmatprep.subr.mxu0 %v278_v11  ;;  %980 = vmatprep.subr.mxu1 %v294_v12  ;;  %v259_v22 = vld [vmem:[%s1134_s23 + $0x48] sm:$0xff]  ;;  %v290_v24 = vld [vmem:[%s1134_s23 + $0x140] sm:$0xff]  ;;  %v289_v27 = vld [vmem:[%s1134_s23 + $0x138] sm:$0xff] }
  0x18   : > { %872 = vmatpush3.msra.mxu0 %v262_v13  ;;  %981 = vmatpush3.msra.mxu1 %v294_v12  ;;  %v258_v25 = vld [vmem:[%s1134_s23 + $0x40] sm:$0xff]  ;;  %v257_v28 = vld [vmem:[%s1134_s23 + $0x38] sm:$0xff]  ;;  %v272_v29 = vld [vmem:[%s1134_s23 + $0xb0] sm:$0xff] }
  0x19   : > { %873 = vmatprep.subr.mxu0 %v277_v14  ;;  %982 = vmatprep.subr.mxu1 %v293_v15  ;;  %v288_v30 = vld [vmem:[%s1134_s23 + $0x130] sm:$0xff]  ;;  %v271_v32 = vld [vmem:[%s1134_s23 + $0xa8] sm:$0xff]  ;;  %v270_v35 = vld [vmem:[%s1134_s23 + $0xa0] sm:$0xff] }
  0x1a   : > { %874 = vmatpush3.msra.mxu0 %v261_v16  ;;  %983 = vmatpush3.msra.mxu1 %v293_v15  ;;  %v256_v31 = vld [vmem:[%s1134_s23 + $0x30] sm:$0xff]  ;;  %v287_v33 = vld [vmem:[%s1134_s23 + $0x128] sm:$0xff]  ;;  %v286_v36 = vld [vmem:[%s1134_s23 + $0x120] sm:$0xff] }
  0x1b   : > { %875 = vmatprep.subr.mxu0 %v276_v17  ;;  %984 = vmatprep.subr.mxu1 %v292_v18  ;;  %v255_v34 = vld [vmem:[%s1134_s23 + $0x28] sm:$0xff]  ;;  %v254_v37 = vld [vmem:[%s1134_s23 + $0x20] sm:$0xff]  ;;  %v269_v38 = vld [vmem:[%s1134_s23 + $0x98] sm:$0xff] }
  0x1c   : > { %876 = vmatpush3.msra.mxu0 %v260_v19  ;;  %985 = vmatpush3.msra.mxu1 %v292_v18  ;;  %v285_v39 = vld [vmem:[%s1134_s23 + $0x118] sm:$0xff]  ;;  %v268_v41 = vld [vmem:[%s1134_s23 + $0x90] sm:$0xff]  ;;  %v267_v44 = vld [vmem:[%s1134_s23 + $0x88] sm:$0xff] }
  0x1d   : > { %877 = vmatprep.subr.mxu0 %v275_v20  ;;  %986 = vmatprep.subr.mxu1 %v291_v21  ;;  %v253_v40 = vld [vmem:[%s1134_s23 + $0x18] sm:$0xff]  ;;  %v284_v42 = vld [vmem:[%s1134_s23 + $0x110] sm:$0xff]  ;;  %v283_v45 = vld [vmem:[%s1134_s23 + $0x108] sm:$0xff] }
  0x1e   : > { %878 = vmatpush3.msra.mxu0 %v259_v22  ;;  %987 = vmatpush3.msra.mxu1 %v291_v21  ;;  %v252_v43 = vld [vmem:[%s1134_s23 + $0x10] sm:$0xff]  ;;  %v251_v46 = vld [vmem:[%s1134_s23 + $0x8] sm:$0xff]  ;;  %v266_v47 = vld [vmem:[%s1134_s23 + $0x80] sm:$0xff] }
  0x1f   : > { %879 = vmatprep.subr.mxu0 %v274_v23  ;;  %988 = vmatprep.subr.mxu1 %v290_v24  ;;  %v282_v48 = vld [vmem:[%s1134_s23 + $0x100] sm:$0xff]  ;;  %v209_v58 = vld [vmem:[%s1431_s1 + $0x38] sm:$0xff]  ;;  %v208_v62 = vld [vmem:[%s1431_s1 + $0x30] sm:$0xff] }
  0x20   : > { %880 = vmatpush3.msra.mxu0 %v258_v25  ;;  %989 = vmatpush3.msra.mxu1 %v290_v24  ;;  %v250_v49 = vld [vmem:[%s1134_s23] sm:$0xff]  ;;  %v300_v61 = vld [vmem:[%s1432_s2 + $0x18] sm:$0xff]  ;;  %v219_v63 = vld [vmem:[%s1431_s1 + $0x88] sm:$0xff] }
  0x21   : > { %881 = vmatprep.subr.mxu0 %v273_v26  ;;  %990 = vmatprep.subr.mxu1 %v289_v27  ;;  %v297_v54 = vld [vmem:[%s1432_s2] sm:$0xff]  ;;  %v212_v0 = vld [vmem:[%s1431_s1 + $0x50] sm:$0xff]  ;;  %v302_v2 = vld [vmem:[%s1432_s2 + $0x28] sm:$0xff] }
  0x22   : > { %882 = vmatpush3.msra.mxu0 %v257_v28  ;;  %991 = vmatpush3.msra.mxu1 %v289_v27  ;;  %v222_v1 = vld [vmem:[%s1431_s1 + $0xa0] sm:$0xff]  ;;  %v211_v4 = vld [vmem:[%s1431_s1 + $0x48] sm:$0xff]  ;;  %v225_v5 = vld [vmem:[%s1431_s1 + $0xb8] sm:$0xff] }
  0x23   : > { %883 = vmatprep.subr.mxu0 %v272_v29  ;;  %992 = vmatprep.subr.mxu1 %v288_v30  ;;  %v301_v3 = vld [vmem:[%s1432_s2 + $0x20] sm:$0xff]  ;;  %v215_v6 = vld [vmem:[%s1431_s1 + $0x68] sm:$0xff]  ;;  %v228_v7 = vld [vmem:[%s1431_s1 + $0xd0] sm:$0xff] }
  0x24   : > { %884 = vmatpush3.msra.mxu0 %v256_v31  ;;  %993 = vmatpush3.msra.mxu1 %v288_v30  ;;  %v304_v8 = vld [vmem:[%s1432_s2 + $0x38] sm:$0xff]  ;;  %v303_v9 = vld [vmem:[%s1432_s2 + $0x30] sm:$0xff]  ;;  %v214_v10 = vld [vmem:[%s1431_s1 + $0x60] sm:$0xff] }
  0x25   : > { %885 = vmatprep.subr.mxu0 %v271_v32  ;;  %994 = vmatprep.subr.mxu1 %v287_v33  ;;  %v231_v11 = vld [vmem:[%s1431_s1 + $0xe8] sm:$0xff]  ;;  %v218_v12 = vld [vmem:[%s1431_s1 + $0x80] sm:$0xff]  ;;  %v217_v16 = vld [vmem:[%s1431_s1 + $0x78] sm:$0xff] }
  0x26   : > { %886 = vmatpush3.msra.mxu0 %v255_v34  ;;  %995 = vmatpush3.msra.mxu1 %v287_v33  ;;  %v234_v13 = vld [vmem:[%s1431_s1 + $0x100] sm:$0xff]  ;;  %v306_v14 = vld [vmem:[%s1432_s2 + $0x48] sm:$0xff]  ;;  %v237_v17 = vld [vmem:[%s1431_s1 + $0x118] sm:$0xff] }
  0x27   : > { %887 = vmatprep.subr.mxu0 %v270_v35  ;;  %996 = vmatprep.subr.mxu1 %v286_v36  ;;  %v305_v15 = vld [vmem:[%s1432_s2 + $0x40] sm:$0xff]  ;;  %v221_v18 = vld [vmem:[%s1431_s1 + $0x98] sm:$0xff]  ;;  %v240_v19 = vld [vmem:[%s1431_s1 + $0x130] sm:$0xff] }
  0x28   : > { %888 = vmatpush3.msra.mxu0 %v254_v37  ;;  %997 = vmatpush3.msra.mxu1 %v286_v36  ;;  %v308_v20 = vld [vmem:[%s1432_s2 + $0x58] sm:$0xff]  ;;  %v307_v21 = vld [vmem:[%s1432_s2 + $0x50] sm:$0xff]  ;;  %v243_v23 = vld [vmem:[%s1431_s1 + $0x148] sm:$0xff] }
  0x29   : > { %889 = vmatprep.subr.mxu0 %v269_v38  ;;  %998 = vmatprep.subr.mxu1 %v285_v39  ;;  %v220_v22 = vld [vmem:[%s1431_s1 + $0x90] sm:$0xff]  ;;  %v246_v25 = vld [vmem:[%s1431_s1 + $0x160] sm:$0xff]  ;;  %v310_v26 = vld [vmem:[%s1432_s2 + $0x68] sm:$0xff] }
  0x2a   : > { %890 = vmatpush3.msra.mxu0 %v253_v40  ;;  %999 = vmatpush3.msra.mxu1 %v285_v39  ;;  %v224_v24 = vld [vmem:[%s1431_s1 + $0xb0] sm:$0xff]  ;;  %v309_v27 = vld [vmem:[%s1432_s2 + $0x60] sm:$0xff]  ;;  %v223_v28 = vld [vmem:[%s1431_s1 + $0xa8] sm:$0xff] }
  0x2b   : > { %891 = vmatprep.subr.mxu0 %v268_v41  ;;  %1000 = vmatprep.subr.mxu1 %v284_v42  ;;  %v249_v29 = vld [vmem:[%s1431_s1 + $0x178] sm:$0x7]  ;;  %v227_v30 = vld [vmem:[%s1431_s1 + $0xc8] sm:$0xff]  ;;  %v311_v32 = vld [vmem:[%s1432_s2 + $0x70] sm:$0xff] }
  0x2c   : > { %892 = vmatpush3.msra.mxu0 %v252_v43  ;;  %1001 = vmatpush3.msra.mxu1 %v284_v42  ;;  %v312_v31 = vld [vmem:[%s1432_s2 + $0x78] sm:$0x7]  ;;  %v226_v33 = vld [vmem:[%s1431_s1 + $0xc0] sm:$0xff]  ;;  %v232_v37 = vld [vmem:[%s1431_s1 + $0xf0] sm:$0xff] }
  0x2d   : > { %893 = vmatprep.subr.mxu0 %v267_v44  ;;  %1002 = vmatprep.subr.mxu1 %v283_v45  ;;  %v230_v34 = vld [vmem:[%s1431_s1 + $0xe0] sm:$0xff]  ;;  %v229_v35 = vld [vmem:[%s1431_s1 + $0xd8] sm:$0xff]  ;;  %v236_v38 = vld [vmem:[%s1431_s1 + $0x110] sm:$0xff] }
  0x2e   : > { %894 = vmatpush3.msra.mxu0 %v251_v46  ;;  %1003 = vmatpush3.msra.mxu1 %v283_v45  ;;  %v233_v36 = vld [vmem:[%s1431_s1 + $0xf8] sm:$0xff]  ;;  %v235_v39 = vld [vmem:[%s1431_s1 + $0x108] sm:$0xff]  ;;  %v238_v41 = vld [vmem:[%s1431_s1 + $0x120] sm:$0xff] }
  0x2f   : > { %895 = vmatprep.subr.mxu0 %v266_v47  ;;  %1004 = vmatprep.subr.mxu1 %v282_v48  ;;  %v239_v40 = vld [vmem:[%s1431_s1 + $0x128] sm:$0xff]  ;;  %v242_v42 = vld [vmem:[%s1431_s1 + $0x140] sm:$0xff]  ;;  %v241_v43 = vld [vmem:[%s1431_s1 + $0x138] sm:$0xff] }
  0x30   : > { %896 = vmatpush3.msra.mxu0 %v250_v49  ;;  %1005 = vmatpush3.msra.mxu1 %v282_v48  ;;  %v245_v44 = vld [vmem:[%s1431_s1 + $0x158] sm:$0xff]  ;;  %v244_v45 = vld [vmem:[%s1431_s1 + $0x150] sm:$0xff]  ;;  %v247_v47 = vld [vmem:[%s1431_s1 + $0x168] sm:$0x7] }
  0x31   : > { %511 = vmatmul.mubr.f32.vlgmr.msra.gmra.mxu0 %v202_v50  ;;  %1007 = vmatmul.mubr.msk.f32.vlgmr.msra.gmra.mxu1 %vm393_vm0, %v207_v51  ;;  %v248_v46 = vld [vmem:[%s1431_s1 + $0x170] sm:$0x7] }
  0x32   : > { %515 = vmatprep.mubr.f32.mxu0 %v206_v52  ;;  %1009 = vmatprep.mubr.msk.f32.mxu1 %vm393_vm0, %v210_v53 }
  0x33   : > { %315 = vperm.xlu0 %1056, %v297_v54   ;;  %330 = vperm.xlu1 %1057, %v300_v61  }
  0x35   : > { %516 = vmatmul.mubr.f32.gmra.mxu0 %v205_v56  ;;  %1010 = vmatmul.mubr.msk.f32.gmra.mxu1 %vm393_vm0, %v213_v57 }
  0x36   : > { %520 = vmatprep.mubr.f32.mxu0 %v209_v58  ;;  %1012 = vmatprep.mubr.msk.f32.mxu1 %vm393_vm0, %v216_v59 }
  0x37   : > { %320 = vperm.xlu0 %1056, %v298_v60   ;;  %340 = vperm.xlu1 %1057, %v302_v2  }
  0x39   : > { %521 = vmatmul.mubr.f32.gmra.mxu0 %v208_v62  ;;  %1013 = vmatmul.mubr.msk.f32.gmra.mxu1 %vm393_vm0, %v219_v63 }
  0x3a   : > { %525 = vmatprep.mubr.f32.mxu0 %v212_v0  ;;  %1015 = vmatprep.mubr.msk.f32.mxu1 %vm393_vm0, %v222_v1 }
  0x3b   : > { %335 = vperm.xlu0 %1056, %v301_v3   ;;  %350 = vperm.xlu1 %1057, %v304_v8  }
  0x3d   : > { %526 = vmatmul.mubr.f32.gmra.mxu0 %v211_v4  ;;  %1016 = vmatmul.mubr.msk.f32.gmra.mxu1 %vm393_vm0, %v225_v5 }
  0x3e   : > { %530 = vmatprep.mubr.f32.mxu0 %v215_v6  ;;  %1018 = vmatprep.mubr.msk.f32.mxu1 %vm393_vm0, %v228_v7 }
  0x3f   : > { %345 = vperm.xlu0 %1056, %v303_v9   ;;  %360 = vperm.xlu1 %1057, %v306_v14  }
  0x41   : > { %531 = vmatmul.mubr.f32.gmra.mxu0 %v214_v10  ;;  %1019 = vmatmul.mubr.msk.f32.gmra.mxu1 %vm393_vm0, %v231_v11 }
  0x42   : > { %535 = vmatprep.mubr.f32.mxu0 %v218_v12  ;;  %1021 = vmatprep.mubr.msk.f32.mxu1 %vm393_vm0, %v234_v13 }
  0x43   : > { %355 = vperm.xlu0 %1056, %v305_v15   ;;  %370 = vperm.xlu1 %1057, %v308_v20  }
  0x45   : > { %536 = vmatmul.mubr.f32.gmra.mxu0 %v217_v16  ;;  %1022 = vmatmul.mubr.msk.f32.gmra.mxu1 %vm393_vm0, %v237_v17 }
  0x46   : > { %540 = vmatprep.mubr.f32.mxu0 %v221_v18  ;;  %1024 = vmatprep.mubr.msk.f32.mxu1 %vm393_vm0, %v240_v19 }
  0x47   : > { %365 = vperm.xlu0 %1056, %v307_v21   ;;  %380 = vperm.xlu1 %1057, %v310_v26  }
  0x49   : > { %541 = vmatmul.mubr.f32.gmra.mxu0 %v220_v22  ;;  %1025 = vmatmul.mubr.msk.f32.gmra.mxu1 %vm393_vm0, %v243_v23 }
  0x4a   : > { %545 = vmatprep.mubr.f32.mxu0 %v224_v24  ;;  %1027 = vmatprep.mubr.msk.f32.mxu1 %vm393_vm0, %v246_v25 }
  0x4b   : > { %375 = vperm.xlu0 %1056, %v309_v27   ;;  %390 = vperm.xlu1 %1057, %v312_v31  }
  0x4d   : > { %546 = vmatmul.mubr.f32.gmra.mxu0 %v223_v28  ;;  %1028 = vmatmul.mubr.msk.f32.gmra.mxu1 %vm393_vm0, %v249_v29 }
  0x4e   : > { %550 = vmatprep.mubr.f32.mxu0 %v227_v30 }
  0x4f   : > { %385 = vperm.xlu0 %1056, %v311_v32  }
  0x51   : > { %551 = vmatmul.mubr.f32.gmra.mxu0 %v226_v33 }
  0x52   : > { %555 = vmatprep.mubr.f32.mxu0 %v230_v34 }
  0x55   : > { %556 = vmatmul.mubr.f32.gmra.mxu0 %v229_v35 }
  0x56   : > { %560 = vmatprep.mubr.f32.mxu0 %v233_v36 }
  0x59   : > { %561 = vmatmul.mubr.f32.gmra.mxu0 %v232_v37 }
  0x5a   : > { %565 = vmatprep.mubr.f32.mxu0 %v236_v38 }
  0x5d   : > { %566 = vmatmul.mubr.f32.gmra.mxu0 %v235_v39 }
  0x5e   : > { %570 = vmatprep.mubr.f32.mxu0 %v239_v40 }
  0x61   : > { %571 = vmatmul.mubr.f32.gmra.mxu0 %v238_v41 }
  0x62   : > { %575 = vmatprep.mubr.f32.mxu0 %v242_v42 }
  0x65   : > { %576 = vmatmul.mubr.f32.gmra.mxu0 %v241_v43 }
  0x66   : > { %580 = vmatprep.mubr.f32.mxu0 %v245_v44 }
  0x69   : > { %581 = vmatmul.mubr.f32.gmra.mxu0 %v244_v45 }
  0x6a   : > { %585 = vmatprep.mubr.f32.mxu0 %v248_v46 }
  0x6d   : > { %586 = vmatmul.mubr.f32.gmra.mxu0 %v247_v47 }
  0x8a   : > { %v326_v62 = vpop.permute.xlu1 %325 }
  0xae   : > { %v316_v48 = vpop.permute.xlu0 %315  ;;  %v331_v7 = vpop.permute.xlu1 %330 }
  0xb2   : > { %v321_v57 = vpop.permute.xlu0 %320  ;;  %v341_v21 = vpop.permute.xlu1 %340 }
  0xb6   : > { %v336_v15 = vpop.permute.xlu0 %335  ;;  %v351_v35 = vpop.permute.xlu1 %350 }
  0xba   : > { %v346_v28 = vpop.permute.xlu0 %345 }
  0xbe   : > { %v356_v42 = vpop.permute.xlu0 %355 }
  0xf1   : > { %v897_v49 = vpop.f32.mrf.mxu0  ;;  %v1008_v50 = vpop.f32.mrf.mxu1 }
  0xf3   : > { %v898_v51 = vpop.f32.mrf.mxu0  ;;  %v657_v54 = vpop.f32.mrf.mxu1 }
  0xf4   : > { %v899_v52 = vadd.f32 %v898_v51, %v897_v49  ;;  %v361_v49 = vpop.permute.xlu1 %360 }
  0xf5   : > { %v900_v53 = vpop.f32.mrf.mxu0  ;;  %v1011_v61 = vpop.f32.mrf.mxu1 }
  0xf6   : > { %v513_v55 = vadd.f32 %v899_v52, %v316_v48 }
  0xf7   : > { %v901_v56 = vpop.f32.mrf.mxu0  ;;  %v667_v4 = vpop.f32.mrf.mxu1 }
  0xf8   : > { %v902_v58 = vadd.f32 %v901_v56, %v900_v53  ;;  %v658_v59 = vadd.f32 %v657_v54, %v513_v55  ;;  %v366_v56 = vpop.permute.xlu0 %365 }
  0xf9   : > { %v903_v60 = vpop.f32.mrf.mxu0  ;;  %v1014_v11 = vpop.f32.mrf.mxu1 }
  0xfa   : > { %737 = vst.msk [vmem:[%s1388_s9] sm:$0xff] %vm736_vm2, %v658_v59  ;;  %v518_v63 = vadd.f32 %v902_v58, %v321_v57 }
  0xfb   : > { %v904_v0 = vpop.f32.mrf.mxu0  ;;  %v677_v18 = vpop.f32.mrf.mxu1 }
  0xfc   : > { %v663_v1 = vadd.f32 %v1008_v50, %v518_v63  ;;  %v905_v2 = vadd.f32 %v904_v0, %v903_v60  ;;  %v371_v63 = vpop.permute.xlu1 %370 }
  0xfd   : > { %v906_v3 = vpop.f32.mrf.mxu0  ;;  %v1017_v25 = vpop.f32.mrf.mxu1 }
  0xfe   : > { %738 = vst.msk [vmem:[%s1388_s9 + $0x8] sm:$0xff] %vm736_vm2, %v663_v1  ;;  %v523_v5 = vadd.f32 %v905_v2, %v326_v62 }
  0xff   : > { %v907_v6 = vpop.f32.mrf.mxu0  ;;  %v687_v32 = vpop.f32.mrf.mxu1 }
 0x100   : > { %v908_v8 = vadd.f32 %v907_v6, %v906_v3  ;;  %v668_v9 = vadd.f32 %v667_v4, %v523_v5  ;;  %v376_v6 = vpop.permute.xlu0 %375 }
 0x101   : > { %v909_v10 = vpop.f32.mrf.mxu0  ;;  %v1020_v39 = vpop.f32.mrf.mxu1 }
 0x102   : > { %v528_v12 = vadd.f32 %v908_v8, %v331_v7  ;;  %739 = vst.msk [vmem:[%s1388_s9 + $0x10] sm:$0xff] %vm736_vm2, %v668_v9 }
 0x103   : > { %v910_v13 = vpop.f32.mrf.mxu0  ;;  %v697_v46 = vpop.f32.mrf.mxu1 }
 0x104   : > { %v673_v14 = vadd.f32 %v1011_v61, %v528_v12  ;;  %v911_v16 = vadd.f32 %v910_v13, %v909_v10  ;;  %v381_v13 = vpop.permute.xlu1 %380 }
 0x105   : > { %v912_v17 = vpop.f32.mrf.mxu0  ;;  %v1023_v53 = vpop.f32.mrf.mxu1 }
 0x106   : > { %740 = vst.msk [vmem:[%s1388_s9 + $0x18] sm:$0xff] %vm736_vm2, %v673_v14  ;;  %v533_v19 = vadd.f32 %v911_v16, %v336_v15 }
 0x107   : > { %v913_v20 = vpop.f32.mrf.mxu0  ;;  %v707_v60 = vpop.f32.mrf.mxu1 }
 0x108   : > { %v914_v22 = vadd.f32 %v913_v20, %v912_v17  ;;  %v678_v23 = vadd.f32 %v677_v18, %v533_v19  ;;  %v386_v20 = vpop.permute.xlu0 %385 }
 0x109   : > { %v915_v24 = vpop.f32.mrf.mxu0  ;;  %v1026_v3 = vpop.f32.mrf.mxu1 }
 0x10a   : > { %v538_v26 = vadd.f32 %v914_v22, %v341_v21  ;;  %741 = vst.msk [vmem:[%s1388_s9 + $0x20] sm:$0xff] %vm736_vm2, %v678_v23 }
 0x10b   : > { %v916_v27 = vpop.f32.mrf.mxu0  ;;  %v717_v10 = vpop.f32.mrf.mxu1 }
 0x10c   : > { %v683_v29 = vadd.f32 %v1014_v11, %v538_v26  ;;  %v917_v30 = vadd.f32 %v916_v27, %v915_v24 }
 0x10d   : > { %v918_v31 = vpop.f32.mrf.mxu0  ;;  %v1029_v17 = vpop.f32.mrf.mxu1 }
 0x10e   : > { %742 = vst.msk [vmem:[%s1388_s9 + $0x28] sm:$0xff] %vm736_vm2, %v683_v29  ;;  %v543_v33 = vadd.f32 %v917_v30, %v346_v28  ;;  %v391_v29 = vpop.permute.xlu1 %390 }
 0x10f   : > { %v919_v34 = vpop.f32.mrf.mxu0  ;;  %v727_v24 = vpop.f32.mrf.mxu1 }
 0x110   : > { %v920_v36 = vadd.f32 %v919_v34, %v918_v31  ;;  %v688_v37 = vadd.f32 %v687_v32, %v543_v33 }
 0x111   : > { %v921_v38 = vpop.f32.mrf.mxu0 }
 0x112   : > { %v548_v40 = vadd.f32 %v920_v36, %v351_v35  ;;  %743 = vst.msk [vmem:[%s1388_s9 + $0x30] sm:$0xff] %vm736_vm2, %v688_v37 }
 0x113   : > { %v922_v41 = vpop.f32.mrf.mxu0 }
 0x114   : > { %v693_v43 = vadd.f32 %v1017_v25, %v548_v40  ;;  %v923_v44 = vadd.f32 %v922_v41, %v921_v38 }
 0x115   : > { %v924_v45 = vpop.f32.mrf.mxu0 }
 0x116   : > { %744 = vst.msk [vmem:[%s1388_s9 + $0x38] sm:$0xff] %vm736_vm2, %v693_v43  ;;  %v553_v47 = vadd.f32 %v923_v44, %v356_v42 }
 0x117   : > { %v925_v48 = vpop.f32.mrf.mxu0 }
 0x118   : > { %v926_v50 = vadd.f32 %v925_v48, %v924_v45  ;;  %v698_v51 = vadd.f32 %v697_v46, %v553_v47 }
 0x119   : > { %v927_v52 = vpop.f32.mrf.mxu0 }
 0x11a   : > { %v558_v54 = vadd.f32 %v926_v50, %v361_v49  ;;  %745 = vst.msk [vmem:[%s1388_s9 + $0x40] sm:$0xff] %vm736_vm2, %v698_v51 }
 0x11b   : > { %v928_v55 = vpop.f32.mrf.mxu0 }
 0x11c   : > { %v703_v57 = vadd.f32 %v1020_v39, %v558_v54  ;;  %v929_v58 = vadd.f32 %v928_v55, %v927_v52 }
 0x11d   : > { %v930_v59 = vpop.f32.mrf.mxu0 }
 0x11e   : > { %746 = vst.msk [vmem:[%s1388_s9 + $0x48] sm:$0xff] %vm736_vm2, %v703_v57  ;;  %v563_v61 = vadd.f32 %v929_v58, %v366_v56 }
 0x11f   : > { %v931_v62 = vpop.f32.mrf.mxu0 }
 0x120   : > { %v932_v0 = vadd.f32 %v931_v62, %v930_v59  ;;  %v708_v1 = vadd.f32 %v707_v60, %v563_v61 }
 0x121   : > { %v933_v2 = vpop.f32.mrf.mxu0 }
 0x122   : > { %v568_v4 = vadd.f32 %v932_v0, %v371_v63  ;;  %747 = vst.msk [vmem:[%s1388_s9 + $0x50] sm:$0xff] %vm736_vm2, %v708_v1 }
 0x123   : > { %v934_v5 = vpop.f32.mrf.mxu0 }
 0x124   : > { %v713_v7 = vadd.f32 %v1023_v53, %v568_v4  ;;  %v935_v8 = vadd.f32 %v934_v5, %v933_v2 }
 0x125   : > { %v936_v9 = vpop.f32.mrf.mxu0 }
 0x126   : > { %748 = vst.msk [vmem:[%s1388_s9 + $0x58] sm:$0xff] %vm736_vm2, %v713_v7  ;;  %v573_v11 = vadd.f32 %v935_v8, %v376_v6 }
 0x127   : > { %v937_v12 = vpop.f32.mrf.mxu0 }
 0x128   : > { %v938_v14 = vadd.f32 %v937_v12, %v936_v9  ;;  %v718_v15 = vadd.f32 %v717_v10, %v573_v11 }
 0x129   : > { %v939_v16 = vpop.f32.mrf.mxu0 }
 0x12a   : > { %v578_v18 = vadd.f32 %v938_v14, %v381_v13  ;;  %749 = vst.msk [vmem:[%s1388_s9 + $0x60] sm:$0xff] %vm736_vm2, %v718_v15 }
 0x12b   : > { %v940_v19 = vpop.f32.mrf.mxu0 }
 0x12c   : > { %v723_v21 = vadd.f32 %v1026_v3, %v578_v18  ;;  %v941_v22 = vadd.f32 %v940_v19, %v939_v16 }
 0x12d   : > { %v942_v23 = vpop.f32.mrf.mxu0 }
 0x12e   : > { %750 = vst.msk [vmem:[%s1388_s9 + $0x68] sm:$0xff] %vm736_vm2, %v723_v21  ;;  %v583_v25 = vadd.f32 %v941_v22, %v386_v20 }
 0x12f   : > { %v943_v26 = vpop.f32.mrf.mxu0 }
 0x130   : > { %v944_v27 = vadd.f32 %v943_v26, %v942_v23  ;;  %v728_v28 = vadd.f32 %v727_v24, %v583_v25 }
 0x132   : > { %v588_v30 = vadd.f32 %v944_v27, %v391_v29  ;;  %751 = vst.msk [vmem:[%s1388_s9 + $0x70] sm:$0xff] %vm736_vm2, %v728_v28 }
 0x134   : > { %v733_v31 = vadd.f32 %v1029_v17, %v588_v30 }
 0x136   : > { %753 = vst.msk [vmem:[%s1388_s9 + $0x78] sm:$0x7] %vm752_vm3, %v733_v31 }
 0x137 PF: > { %s13_s14 = sadd.s32 1, %s1080_s14   ;;  %s1434_s12 = smov %s1076_s13 }
 0x138   : > { %p10_p5 = scmp.ge.s32.totalorder %s13_s14, 4   ;;  %s1435_s13 = smov %s1437_s15 }
 0x13a   :  { %12 = sbr.rel (!%p10_p5) target bundleno = 2 (0x2), region = 62 }

</bundles_post_ra>
